<compile_context>
chip_gen: v6e
topology: v6e:2x2x1
jax: 0.10.0
libtpu: 0.0.40
codegen_flags: <defaults>
</compile_context>

<pallas_src>
import jax
import jax.numpy as jnp
from jax.experimental import pallas as pl
from jax.experimental.pallas import tpu as pltpu


def _leaky_relu(x, slope=0.01):
    return jnp.where(x > 0, x, slope * x)


def _mlp_kernel(x_ref, w1_ref, b1_ref, w2_ref, b2_ref, w3_ref, b3_ref, o_ref):
    # x_ref:  (1, C, TT)   input tile, T on the lane axis
    # w1: (H, C)  b1: (H, 1)   w2: (H, H)  b2: (H, 1)   w3: (D, H)  b3: (D, 1)
    # o_ref:  (1, TT, D)   output tile in the PyTorch (B, T, D) layout
    xt = x_ref[0]                                                    # (C, TT)
    h = jnp.dot(w1_ref[...], xt, preferred_element_type=jnp.float32)
    h = _leaky_relu(h + b1_ref[...])                                 # (H, TT)
    h = jnp.dot(w2_ref[...], h, preferred_element_type=jnp.float32)
    h = _leaky_relu(h + b2_ref[...])                                 # (H, TT)
    y = jnp.dot(w3_ref[...], h, preferred_element_type=jnp.float32)
    y = y + b3_ref[...]                                              # (D, TT)
    # Tiny XLU transpose so the store matches the (B, T, D) output layout.
    o_ref[0] = jnp.transpose(y).astype(o_ref.dtype)                  # (TT, D)


def ts_deep_fc_encoder(x, params, *, t_tile_max=512):
    """x: (B, C, T) float32 (PyTorch layout). Returns (B, T, Dim)."""
    w1, b1, w2, b2, w3, b3 = params
    B, C, T = x.shape
    H = w1.shape[0]
    D = w3.shape[0]

    # Pad T to a multiple of 128 (lane-dense tiles); only copies when needed.
    t_pad = max(128, -(-T // 128) * 128)
    if t_pad != T:
        x = jnp.pad(x, ((0, 0), (0, 0), (0, t_pad - T)))

    # Largest lane-dense tile (<= t_tile_max) dividing the padded T.
    t_tile_max = max(int(t_tile_max), 128)
    t_tile = next(c for c in (t_tile_max, 512, 256, 128)
                  if c <= t_tile_max and t_pad % c == 0)
    grid = (B, t_pad // t_tile)

    flops = 2 * B * t_pad * (C * H + H * H + H * D)
    bytes_accessed = 4 * (B * C * t_pad + B * t_pad * D
                          + C * H + H * H + H * D + 2 * H + D)

    const = lambda b, t: (0, 0)  # weights/biases: DMA'd once, stay resident
    out = pl.pallas_call(
        _mlp_kernel,
        out_shape=jax.ShapeDtypeStruct((B, t_pad, D), jnp.float32),
        grid=grid,
        in_specs=[
            pl.BlockSpec((1, C, t_tile), lambda b, t: (b, 0, t)),
            pl.BlockSpec((H, C), const),
            pl.BlockSpec((H, 1), const),
            pl.BlockSpec((H, H), const),
            pl.BlockSpec((H, 1), const),
            pl.BlockSpec((D, H), const),
            pl.BlockSpec((D, 1), const),
        ],
        out_specs=pl.BlockSpec((1, t_tile, D), lambda b, t: (b, t, 0)),
        compiler_params=pltpu.CompilerParams(
            dimension_semantics=("parallel", "parallel"),
            vmem_limit_bytes=32 * 1024 * 1024,
        ),
        cost_estimate=pl.CostEstimate(
            flops=flops, transcendentals=0, bytes_accessed=bytes_accessed),
    )(x, w1, b1, w2, b2, w3, b3)

    if t_pad != T:
        out = out[:, :T, :]
    return out


def init_params(key, n_channels, dim):
    """PyTorch nn.Linear-style init; weights stored (out, in), biases (out, 1)."""
    hidden = 10 * dim
    ks = jax.random.split(key, 6)

    def linear(kw, kb, fan_in, fan_out):
        bound = 1.0 / float(fan_in) ** 0.5
        w = jax.random.uniform(kw, (fan_out, fan_in), jnp.float32, -bound, bound)
        b = jax.random.uniform(kb, (fan_out, 1), jnp.float32, -bound, bound)
        return w, b

    w1, b1 = linear(ks[0], ks[1], n_channels, hidden)
    w2, b2 = linear(ks[2], ks[3], hidden, hidden)
    w3, b3 = linear(ks[4], ks[5], hidden, dim)
    return (w1, b1, w2, b2, w3, b3)


def _reference(x, params):
    w1, b1, w2, b2, w3, b3 = params
    h = jnp.transpose(x, (0, 2, 1))
    h = _leaky_relu(h @ w1.T + b1[:, 0])
    h = _leaky_relu(h @ w2.T + b2[:, 0])
    return h @ w3.T + b3[:, 0]


if __name__ == "__main__":
    key = jax.random.PRNGKey(0)
    k_x, k_p = jax.random.split(key)

    # Small shapes consistent with the module: nChannels=4, Dim=8, T=128 keeps
    # a single lane-dense tile per batch element.
    B, C, T, DIM = 2, 4, 128, 8
    x = jax.random.normal(k_x, (B, C, T), dtype=jnp.float32)
    params = init_params(k_p, C, DIM)

    out = jax.block_until_ready(ts_deep_fc_encoder(x, params))
    ref = _reference(x, params)

    assert out.shape == (B, T, DIM), out.shape
    assert jnp.allclose(out, ref, atol=2e-4, rtol=2e-4), (
        "mismatch vs reference, max abs err = %s"
        % float(jnp.max(jnp.abs(out - ref))))

    print("KERNEL_OK")
</pallas_src>

<mosaic_0001>
module attributes {stable_mosaic.version = 11 : i64} {
  func.func @_mlp_kernel(%arg0: i32, %arg1: i32, %arg2: memref<1x4x128xf32, #tpu.memory_space<vmem>>, %arg3: memref<80x4xf32, #tpu.memory_space<vmem>>, %arg4: memref<80x1xf32, #tpu.memory_space<vmem>>, %arg5: memref<80x80xf32, #tpu.memory_space<vmem>>, %arg6: memref<80x1xf32, #tpu.memory_space<vmem>>, %arg7: memref<8x80xf32, #tpu.memory_space<vmem>>, %arg8: memref<8x1xf32, #tpu.memory_space<vmem>>, %arg9: memref<1x128x8xf32, #tpu.memory_space<vmem>>) attributes {dimension_semantics = [#tpu.dimension_semantics<parallel>, #tpu.dimension_semantics<parallel>], iteration_bounds = array<i64: 2, 1>, scalar_prefetch = 0 : i64, scratch_operands = 0 : i64, tpu.core_type = #tpu.core_type<tc>, window_params = [{transform_indices = @transform_0, window_bounds = array<i64: 1, 4, 128>}, {pipeline_mode = #tpu.pipeline_mode<synchronous>, transform_indices = @transform_1, window_bounds = array<i64: 80, 4>}, {pipeline_mode = #tpu.pipeline_mode<synchronous>, transform_indices = @transform_2, window_bounds = array<i64: 80, 1>}, {pipeline_mode = #tpu.pipeline_mode<synchronous>, transform_indices = @transform_3, window_bounds = array<i64: 80, 80>}, {pipeline_mode = #tpu.pipeline_mode<synchronous>, transform_indices = @transform_4, window_bounds = array<i64: 80, 1>}, {pipeline_mode = #tpu.pipeline_mode<synchronous>, transform_indices = @transform_5, window_bounds = array<i64: 8, 80>}, {pipeline_mode = #tpu.pipeline_mode<synchronous>, transform_indices = @transform_6, window_bounds = array<i64: 8, 1>}, {transform_indices = @transform_7, window_bounds = array<i64: 1, 128, 8>}]} {
    %c0 = arith.constant 0 : index
    %c0_0 = arith.constant 0 : index
    %c0_1 = arith.constant 0 : index
    %0 = vector.load %arg2[%c0, %c0_0, %c0_1] : memref<1x4x128xf32, #tpu.memory_space<vmem>>, vector<1x4x128xf32>
    %1 = vector.shape_cast %0 : vector<1x4x128xf32> to vector<4x128xf32>
    %c0_2 = arith.constant 0 : index
    %c0_3 = arith.constant 0 : index
    %2 = vector.load %arg3[%c0_2, %c0_3] : memref<80x4xf32, #tpu.memory_space<vmem>>, vector<80x4xf32>
    %cst = arith.constant dense<0.000000e+00> : vector<80x128xf32>
    %3 = tpu.matmul %2, %1, %cst {dimension_numbers = #tpu.dot_dimension_numbers<[1], [0], [0], [1], [0, 0, 1, 1], [], []>} : vector<80x4xf32>, vector<4x128xf32>, vector<80x128xf32> -> vector<80x128xf32>
    %c0_4 = arith.constant 0 : index
    %c0_5 = arith.constant 0 : index
    %4 = vector.load %arg4[%c0_4, %c0_5] : memref<80x1xf32, #tpu.memory_space<vmem>>, vector<80x1xf32>
    %5 = vector.broadcast %4 : vector<80x1xf32> to vector<80x128xf32>
    %6 = arith.addf %3, %5 : vector<80x128xf32>
    %cst_6 = arith.constant 0.000000e+00 : f32
    %7 = vector.broadcast %cst_6 : f32 to vector<80x128xf32>
    %8 = arith.cmpf ogt, %6, %7 : vector<80x128xf32>
    %cst_7 = arith.constant 0.00999999977 : f32
    %9 = vector.broadcast %cst_7 : f32 to vector<80x128xf32>
    %10 = arith.mulf %9, %6 : vector<80x128xf32>
    %11 = arith.select %8, %6, %10 : vector<80x128xi1>, vector<80x128xf32>
    %c0_8 = arith.constant 0 : index
    %c0_9 = arith.constant 0 : index
    %12 = vector.load %arg5[%c0_8, %c0_9] : memref<80x80xf32, #tpu.memory_space<vmem>>, vector<80x80xf32>
    %cst_10 = arith.constant dense<0.000000e+00> : vector<80x128xf32>
    %13 = tpu.matmul %12, %11, %cst_10 {dimension_numbers = #tpu.dot_dimension_numbers<[1], [0], [0], [1], [0, 0, 1, 1], [], []>} : vector<80x80xf32>, vector<80x128xf32>, vector<80x128xf32> -> vector<80x128xf32>
    %c0_11 = arith.constant 0 : index
    %c0_12 = arith.constant 0 : index
    %14 = vector.load %arg6[%c0_11, %c0_12] : memref<80x1xf32, #tpu.memory_space<vmem>>, vector<80x1xf32>
    %15 = vector.broadcast %14 : vector<80x1xf32> to vector<80x128xf32>
    %16 = arith.addf %13, %15 : vector<80x128xf32>
    %cst_13 = arith.constant 0.000000e+00 : f32
    %17 = vector.broadcast %cst_13 : f32 to vector<80x128xf32>
    %18 = arith.cmpf ogt, %16, %17 : vector<80x128xf32>
    %cst_14 = arith.constant 0.00999999977 : f32
    %19 = vector.broadcast %cst_14 : f32 to vector<80x128xf32>
    %20 = arith.mulf %19, %16 : vector<80x128xf32>
    %21 = arith.select %18, %16, %20 : vector<80x128xi1>, vector<80x128xf32>
    %c0_15 = arith.constant 0 : index
    %c0_16 = arith.constant 0 : index
    %22 = vector.load %arg7[%c0_15, %c0_16] : memref<8x80xf32, #tpu.memory_space<vmem>>, vector<8x80xf32>
    %cst_17 = arith.constant dense<0.000000e+00> : vector<8x128xf32>
    %23 = tpu.matmul %22, %21, %cst_17 {dimension_numbers = #tpu.dot_dimension_numbers<[1], [0], [0], [1], [0, 0, 1, 1], [], []>} : vector<8x80xf32>, vector<80x128xf32>, vector<8x128xf32> -> vector<8x128xf32>
    %c0_18 = arith.constant 0 : index
    %c0_19 = arith.constant 0 : index
    %24 = vector.load %arg8[%c0_18, %c0_19] : memref<8x1xf32, #tpu.memory_space<vmem>>, vector<8x1xf32>
    %25 = vector.broadcast %24 : vector<8x1xf32> to vector<8x128xf32>
    %26 = arith.addf %23, %25 : vector<8x128xf32>
    %27 = tpu.transpose %26, [1, 0] : vector<8x128xf32> -> vector<128x8xf32>
    %c0_20 = arith.constant 0 : index
    %c0_21 = arith.constant 0 : index
    %c0_22 = arith.constant 0 : index
    %28 = vector.load %arg9[%c0_20, %c0_21, %c0_22] : memref<1x128x8xf32, #tpu.memory_space<vmem>>, vector<1x128x8xf32>
    %29 = vector.shape_cast %28 : vector<1x128x8xf32> to vector<128x8xf32>
    %30 = vector.shape_cast %27 : vector<128x8xf32> to vector<1x128x8xf32>
    tpu.vector_store %arg9[%c0_20, %c0_21, %c0_22], %30 {strides = array<i32>} : memref<1x128x8xf32, #tpu.memory_space<vmem>>, vector<1x128x8xf32>,
    return
  }
  func.func @transform_0(%arg0: i32, %arg1: i32) -> (i32, i32, i32) {
    %c0_i32 = arith.constant 0 : i32
    %c0_i32_0 = arith.constant 0 : i32
    return %arg0, %c0_i32, %arg1 : i32, i32, i32
  }
  func.func @transform_1(%arg0: i32, %arg1: i32) -> (i32, i32) {
    %c0_i32 = arith.constant 0 : i32
    %c0_i32_0 = arith.constant 0 : i32
    %c0_i32_1 = arith.constant 0 : i32
    return %c0_i32, %c0_i32_0 : i32, i32
  }
  func.func @transform_2(%arg0: i32, %arg1: i32) -> (i32, i32) {
    %c0_i32 = arith.constant 0 : i32
    %c0_i32_0 = arith.constant 0 : i32
    %c0_i32_1 = arith.constant 0 : i32
    return %c0_i32, %c0_i32_0 : i32, i32
  }
  func.func @transform_3(%arg0: i32, %arg1: i32) -> (i32, i32) {
    %c0_i32 = arith.constant 0 : i32
    %c0_i32_0 = arith.constant 0 : i32
    %c0_i32_1 = arith.constant 0 : i32
    return %c0_i32, %c0_i32_0 : i32, i32
  }
  func.func @transform_4(%arg0: i32, %arg1: i32) -> (i32, i32) {
    %c0_i32 = arith.constant 0 : i32
    %c0_i32_0 = arith.constant 0 : i32
    %c0_i32_1 = arith.constant 0 : i32
    return %c0_i32, %c0_i32_0 : i32, i32
  }
  func.func @transform_5(%arg0: i32, %arg1: i32) -> (i32, i32) {
    %c0_i32 = arith.constant 0 : i32
    %c0_i32_0 = arith.constant 0 : i32
    %c0_i32_1 = arith.constant 0 : i32
    return %c0_i32, %c0_i32_0 : i32, i32
  }
  func.func @transform_6(%arg0: i32, %arg1: i32) -> (i32, i32) {
    %c0_i32 = arith.constant 0 : i32
    %c0_i32_0 = arith.constant 0 : i32
    %c0_i32_1 = arith.constant 0 : i32
    return %c0_i32, %c0_i32_0 : i32, i32
  }
  func.func @transform_7(%arg0: i32, %arg1: i32) -> (i32, i32, i32) {
    %c0_i32 = arith.constant 0 : i32
    %c0_i32_0 = arith.constant 0 : i32
    return %arg0, %arg1, %c0_i32 : i32, i32, i32
  }
}

</mosaic_0001>

<bundles_post_ra>
// kernel: tpu_custom_call.1
= control target key start
LH: loop header
LB: loop body
LE: loop exit
PB: predicated region body
PF: predicated region fallthrough
CT: control target
= control target key end

     0   :  { %s1266_s24 = smov 0   ;;  %s1268_s25 = smov 0   ;;  %s1495_s0 = inlined_call_operand.vmem [shape: f32[2,4,128], index: 0, kind: input, shape index: {}]   ;;  %s1496_s1 = inlined_call_operand.vmem [shape: f32[80,4], index: 1, kind: input, shape index: {}]   ;;  %s1497_s2 = inlined_call_operand.vmem [shape: f32[80,1], index: 2, kind: input, shape index: {}]   ;;  %s1498_s3 = inlined_call_operand.vmem [shape: f32[80,80], index: 3, kind: input, shape index: {}]   ;;  %s1499_s4 = inlined_call_operand.vmem [shape: f32[80,1], index: 4, kind: input, shape index: {}]   ;;  %s1500_s5 = inlined_call_operand.vmem [shape: f32[8,80], index: 5, kind: input, shape index: {}]   ;;  %s1501_s6 = inlined_call_operand.vmem [shape: f32[8,1], index: 6, kind: input, shape index: {}]   ;;  %s1502_s7 = inlined_call_operand.vmem [shape: f32[2,128,8], index: 7, kind: output, shape index: {}]  }
   0x1   :  { %s1270_s26 = smov 0  }
   0x2 LB: > { %s29_s27 = sadd.s32 1, %s1217_s25  ;;  %p1024_p0 = scmp.ge.s32.totalorder %s1221_s26, 1  ;;  %s1221_s26 = sphi %s1270_s26, %s17_s26   ;;  %s1217_s25 = sphi %s1268_s25, %s1504_s25   ;;  %s1213_s24 = sphi %s1266_s24, %s1503_s24  }
   0x3   : > { %p31_p1 = scmp.ge.s32.totalorder %s29_s27, 2  ;;  %p255_p2 = scmp.lt.s32.totalorder %s1221_s26, 3 }
   0x5   : > { %s1506_s27 = smov (%p31_p1, %s29_s27), 0  ;;  %p256_p3 = pnand %p1024_p0, %p255_p2 }
   0x6   : > { %p293_p4 = scmp.lt.s32.totalorder (!%p256_p3), %s1213_s24, 1 }
   0x7   : > { %259 = sbr.rel (%p256_p3) target bundleno = 866 (0x362), region = 48 }
   0xc   : > { %v311_v0 = vld [vmem:[%s1496_s1] sm:$0xff]  ;;  %vm381_vm0 = vcmask 31744   ;;  %s1508_s24 = smov (!%p293_p4, %s1213_s24), 1  ;;  %v1223_v1 = vmov 0   ;;  %v330_v2 = vld [vmem:[%s1497_s2 + $0x48] sm:$0xff]  ;;  %vm412_vm1 = vcmask 1043456  }
   0xd   : > { %1097 = vmatprep.mubr.msk.f32.mxu0 %vm381_vm0, %v311_v0  ;;  %1197 = vset.pattern.permute.xlu0 %v1223_v1  ;;  %s1025_s9 = sshll.u32 %s1508_s24, 2  ;;  %v328_v3 = vld [vmem:[%s1497_s2 + $0x38] sm:$0xff]  ;;  %v329_v4 = vld [vmem:[%s1497_s2 + $0x40] sm:$0xff]  ;;  %v312_v6 = vld [vmem:[%s1496_s1 + $0x8] sm:$0xff]  ;;  %vm631_vm2 = vcmask 654336   ;;  %vm1225_vm13 = vmmov 0  }
   0xe   : > { %1198 = vset.pattern.permute.xlu1 %v1223_v1  ;;  %378 = vperm.xlu0 %1197, %v330_v2   ;;  %s299_s14 = scalar_lea.vmem %s1495_s0, %s1025_s9  ;;  %v327_v7 = vld [vmem:[%s1497_s2 + $0x30] sm:$0xff]  ;;  %v326_v9 = vld [vmem:[%s1497_s2 + $0x28] sm:$0xff]  ;;  %v314_v10 = vld [vmem:[%s1496_s1 + $0x18] sm:$0xff]  ;;  %s1052_s17 = sshll.u32 %s1508_s24, 7 }
   0xf   : > { %368 = vperm.xlu1 %1198, %v328_v3   ;;  %v310_v5 = vld [vmem:[%s299_s14] sm:$0xf]  ;;  %v313_v8 = vld [vmem:[%s1496_s1 + $0x10] sm:$0xff]  ;;  %v324_v13 = vld [vmem:[%s1497_s2 + $0x18] sm:$0xff]  ;;  %s1452_s20 = scalar_lea.vmem %s1502_s7, %s1052_s17 }
  0x10   : > { %1095 = vmatprep.subr.msk.mxu0 %vm412_vm1, %v310_v5  ;;  %v325_v11 = vld [vmem:[%s1497_s2 + $0x20] sm:$0xff]  ;;  %v316_v14 = vld [vmem:[%s1496_s1 + $0x28] sm:$0xff]  ;;  %v323_v15 = vld [vmem:[%s1497_s2 + $0x10] sm:$0xff] }
  0x11   : > { %1096 = vmatpush3.msk.msra.mxu0 %vm412_vm1, %v310_v5  ;;  %v315_v12 = vld [vmem:[%s1496_s1 + $0x20] sm:$0xff]  ;;  %v317_v16 = vld [vmem:[%s1496_s1 + $0x30] sm:$0xff]  ;;  %v322_v17 = vld [vmem:[%s1497_s2 + $0x8] sm:$0xff] }
  0x12   : > { %373 = vperm.xlu0 %1197, %v329_v4   ;;  %1098 = vmatmul.mubr.msk.f32.vlgmr.msra.gmra.mxu0 %vm381_vm0, %v312_v6  ;;  %v318_v18 = vld [vmem:[%s1496_s1 + $0x38] sm:$0xff]  ;;  %v321_v19 = vld [vmem:[%s1497_s2] sm:$0xff]  ;;  %v580_v21 = vld [vmem:[%s1499_s4 + $0x48] sm:$0xff] }
  0x13   : > { %363 = vperm.xlu1 %1198, %v327_v7   ;;  %1100 = vmatprep.mubr.msk.f32.mxu0 %vm381_vm0, %v313_v8  ;;  %v319_v20 = vld [vmem:[%s1496_s1 + $0x40] sm:$0xff]  ;;  %v320_v22 = vld [vmem:[%s1496_s1 + $0x48] sm:$0xff]  ;;  %v578_v24 = vld [vmem:[%s1499_s4 + $0x38] sm:$0xff] }
  0x14   : > { %v579_v23 = vld [vmem:[%s1499_s4 + $0x40] sm:$0xff]  ;;  %v577_v25 = vld [vmem:[%s1499_s4 + $0x30] sm:$0xff]  ;;  %v576_v26 = vld [vmem:[%s1499_s4 + $0x28] sm:$0xff] }
  0x15   : > { %v575_v27 = vld [vmem:[%s1499_s4 + $0x20] sm:$0xff]  ;;  %v574_v28 = vld [vmem:[%s1499_s4 + $0x18] sm:$0xff]  ;;  %v573_v29 = vld [vmem:[%s1499_s4 + $0x10] sm:$0xff] }
  0x16   : > { %358 = vperm.xlu0 %1197, %v326_v9   ;;  %1101 = vmatmul.mubr.msk.f32.gmra.mxu0 %vm381_vm0, %v314_v10  ;;  %v572_v30 = vld [vmem:[%s1499_s4 + $0x8] sm:$0xff]  ;;  %v571_v31 = vld [vmem:[%s1499_s4] sm:$0xff] }
  0x17   : > { %353 = vperm.xlu1 %1198, %v325_v11   ;;  %1103 = vmatprep.mubr.msk.f32.mxu0 %vm381_vm0, %v315_v12  ;;  %v808_v32 = vld [vmem:[%s1501_s6] sm:$0xff] }
  0x18   : > { %v561_v33 = vld [vmem:[%s1498_s3] sm:$0xff] }
  0x19   : > { %1132 = vmatprep.mubr.msk.f32.mxu1 %vm631_vm2, %v561_v33 }
  0x1a   : > { %348 = vperm.xlu0 %1197, %v324_v13   ;;  %1104 = vmatmul.mubr.msk.f32.gmra.mxu0 %vm381_vm0, %v316_v14 }
  0x1b   : > { %343 = vperm.xlu1 %1198, %v323_v15   ;;  %1106 = vmatprep.mubr.msk.f32.mxu0 %vm381_vm0, %v317_v16 }
  0x1e   : > { %338 = vperm.xlu0 %1197, %v322_v17   ;;  %1107 = vmatmul.mubr.msk.f32.gmra.mxu0 %vm381_vm0, %v318_v18 }
  0x1f   : > { %333 = vperm.xlu1 %1198, %v321_v19   ;;  %1109 = vmatprep.mubr.msk.f32.mxu0 %vm381_vm0, %v319_v20  ;;  %v562_v20 = vld [vmem:[%s1498_s3 + $0x8] sm:$0xff] }
  0x22   : > { %628 = vperm.xlu0 %1197, %v580_v21   ;;  %1110 = vmatmul.mubr.msk.f32.gmra.mxu0 %vm381_vm0, %v320_v22  ;;  %v563_v21 = vld [vmem:[%s1498_s3 + $0x10] sm:$0xff]  ;;  %v564_v22 = vld [vmem:[%s1498_s3 + $0x18] sm:$0xff] }
  0x23   : > { %623 = vperm.xlu1 %1198, %v579_v23   ;;  %v565_v23 = vld [vmem:[%s1498_s3 + $0x20] sm:$0xff] }
  0x26   : > { %618 = vperm.xlu0 %1197, %v578_v24   ;;  %v566_v24 = vld [vmem:[%s1498_s3 + $0x28] sm:$0xff] }
  0x27   : > { %613 = vperm.xlu1 %1198, %v577_v25   ;;  %v567_v25 = vld [vmem:[%s1498_s3 + $0x30] sm:$0xff] }
  0x2a   : > { %608 = vperm.xlu0 %1197, %v576_v26   ;;  %v568_v26 = vld [vmem:[%s1498_s3 + $0x38] sm:$0xff] }
  0x2b   : > { %603 = vperm.xlu1 %1198, %v575_v27   ;;  %v569_v27 = vld [vmem:[%s1498_s3 + $0x40] sm:$0xff] }
  0x2e   : > { %598 = vperm.xlu0 %1197, %v574_v28   ;;  %v570_v28 = vld [vmem:[%s1498_s3 + $0x48] sm:$0xff] }
  0x2f   : > { %593 = vperm.xlu1 %1198, %v573_v29   ;;  %v1224_v29 = vmov 0.0  }
  0x30   : > { %1147 = vmatprep.subr.mxu0 %v1224_v29  ;;  %1167 = vmatprep.mubr.msk.f32.mxu0 %vm1225_vm13, %v1224_v29 }
  0x32   : > { %588 = vperm.xlu0 %1197, %v572_v30  }
  0x33   : > { %583 = vperm.xlu1 %1198, %v571_v31  }
  0x36   : > { %811 = vperm.xlu0 %1197, %v808_v32  }
  0x89   : > { %v379_v36 = vpop.permute.xlu0 %378 }
  0x8a   : > { %v369_v38 = vpop.permute.xlu1 %368 }
  0x8d   : > { %v374_v41 = vpop.permute.xlu0 %373 }
  0x8e   : > { %v364_v43 = vpop.permute.xlu1 %363 }
  0x91   : > { %v359_v46 = vpop.permute.xlu0 %358 }
  0x92   : > { %v354_v50 = vpop.permute.xlu1 %353 }
  0x95   : > { %v349_v59 = vpop.permute.xlu0 %348 }
  0x96   : > { %v344_v63 = vpop.permute.xlu1 %343 }
  0x99   : > { %v339_v6 = vpop.permute.xlu0 %338 }
  0x9a   : > { %v334_v10 = vpop.permute.xlu1 %333 }
  0x9d   : > { %v629_v32 = vpop.permute.xlu0 %628 }
  0xd2   : > { %v1099_v34 = vpop.f32.mrf.mxu0 }
  0xd3   : > { %v488_v7 = vadd.f32 %v1099_v34, %v339_v6  ;;  %v624_v34 = vpop.permute.xlu1 %623 }
  0xd4   : > { %v482_v35 = vpop.f32.mrf.mxu0 }
  0xd5   : > { %v483_v11 = vadd.f32 %v482_v35, %v334_v10  ;;  %v542_v14 = vmul.f32 0.01, %v488_v7  ;;  %vm532_vm11 = vcmp.gt.f32.partialorder %v488_v7, 0.0 }
  0xd6   : > { %v1102_v37 = vpop.f32.mrf.mxu0 }
  0xd7   : > { %v498_v0 = vadd.f32 %v1102_v37, %v349_v59  ;;  %v541_v16 = vmul.f32 0.01, %v483_v11  ;;  %vm531_vm12 = vcmp.gt.f32.partialorder %v483_v11, 0.0  ;;  %v552_v18 = vsel %vm532_vm11, %v488_v7, %v542_v14  ;;  %v619_v37 = vpop.permute.xlu0 %618 }
  0xd8   : > { %v492_v39 = vpop.f32.mrf.mxu0 }
  0xd9   : > { %v493_v3 = vadd.f32 %v492_v39, %v344_v63  ;;  %v544_v8 = vmul.f32 0.01, %v498_v0  ;;  %vm534_vm9 = vcmp.gt.f32.partialorder %v498_v0, 0.0  ;;  %v551_v19 = vsel %vm531_vm12, %v483_v11, %v541_v16  ;;  %v614_v39 = vpop.permute.xlu1 %613 }
  0xda   : > { %v1105_v40 = vpop.f32.mrf.mxu0 }
  0xdb   : > { %v508_v55 = vadd.f32 %v1105_v40, %v359_v46  ;;  %v543_v12 = vmul.f32 0.01, %v493_v3  ;;  %vm533_vm10 = vcmp.gt.f32.partialorder %v493_v3, 0.0  ;;  %v554_v15 = vsel %vm534_vm9, %v498_v0, %v544_v8 }
  0xdc   : > { %v502_v42 = vpop.f32.mrf.mxu0  ;;  %vm919_vm9 = vcmask 64512  }
  0xdd   : > { %v503_v60 = vadd.f32 %v502_v42, %v354_v50  ;;  %v546_v1 = vmul.f32 0.01, %v508_v55  ;;  %vm536_vm7 = vcmp.gt.f32.partialorder %v508_v55, 0.0  ;;  %v553_v17 = vsel %vm533_vm10, %v493_v3, %v543_v12  ;;  %v609_v42 = vpop.permute.xlu0 %608  ;;  %v604_v46 = vpop.permute.xlu1 %603 }
  0xde   : > { %v1108_v44 = vpop.f32.mrf.mxu0 }
  0xdf   : > { %v518_v48 = vadd.f32 %v1108_v44, %v369_v38  ;;  %v545_v4 = vmul.f32 0.01, %v503_v60  ;;  %vm535_vm8 = vcmp.gt.f32.partialorder %v503_v60, 0.0  ;;  %v556_v9 = vsel %vm536_vm7, %v508_v55, %v546_v1 }
  0xe0   : > { %v512_v45 = vpop.f32.mrf.mxu0 }
  0xe1   : > { %v513_v52 = vadd.f32 %v512_v45, %v364_v43  ;;  %v548_v56 = vmul.f32 0.01, %v518_v48  ;;  %vm538_vm5 = vcmp.gt.f32.partialorder %v518_v48, 0.0  ;;  %v555_v13 = vsel %vm535_vm8, %v503_v60, %v545_v4  ;;  %v599_v55 = vpop.permute.xlu0 %598  ;;  %v594_v59 = vpop.permute.xlu1 %593 }
  0xe2   : > { %v1111_v47 = vpop.f32.mrf.mxu0 }
  0xe3   : > { %v528_v49 = vadd.f32 %v1111_v47, %v379_v36  ;;  %v547_v61 = vmul.f32 0.01, %v513_v52  ;;  %vm537_vm6 = vcmp.gt.f32.partialorder %v513_v52, 0.0  ;;  %v558_v2 = vsel %vm538_vm5, %v518_v48, %v548_v56 }
  0xe4   : > { %v522_v51 = vpop.f32.mrf.mxu0 }
  0xe5   : > { %v523_v53 = vadd.f32 %v522_v51, %v374_v41  ;;  %vm540_vm3 = vcmp.gt.f32.partialorder %v528_v49, 0.0  ;;  %v550_v54 = vmul.f32 0.01, %v528_v49  ;;  %v557_v5 = vsel %vm537_vm6, %v513_v52, %v547_v61  ;;  %v584_v6 = vpop.permute.xlu1 %583 }
  0xe7   : > { %v549_v57 = vmul.f32 0.01, %v523_v53  ;;  %v560_v58 = vsel %vm540_vm3, %v528_v49, %v550_v54  ;;  %vm539_vm4 = vcmp.gt.f32.partialorder %v523_v53, 0.0 }
  0xe8   : > { %1112 = vmatprep.subr.mxu1 %v560_v58 }
  0xe9   : > { %1113 = vmatpush3.msra.mxu1 %v560_v58  ;;  %v559_v62 = vsel %vm539_vm4, %v523_v53, %v549_v57 }
  0xea   : > { %1114 = vmatprep.subr.mxu1 %v559_v62 }
  0xeb   : > { %1115 = vmatpush3.msra.mxu1 %v559_v62 }
  0xec   : > { %1116 = vmatprep.subr.mxu1 %v558_v2 }
  0xed   : > { %1117 = vmatpush3.msra.mxu1 %v558_v2  ;;  %v589_v2 = vpop.permute.xlu0 %588 }
  0xee   : > { %1118 = vmatprep.subr.mxu1 %v557_v5 }
  0xef   : > { %1119 = vmatpush3.msra.mxu1 %v557_v5 }
  0xf0   : > { %1120 = vmatprep.subr.mxu1 %v556_v9 }
  0xf1   : > { %1121 = vmatpush3.msra.mxu1 %v556_v9 }
  0xf2   : > { %1122 = vmatprep.subr.mxu1 %v555_v13 }
  0xf3   : > { %1123 = vmatpush3.msra.mxu1 %v555_v13 }
  0xf4   : > { %1124 = vmatprep.subr.mxu1 %v554_v15 }
  0xf5   : > { %1125 = vmatpush3.msra.mxu1 %v554_v15  ;;  %v807_v15 = vld [vmem:[%s1500_s5] sm:$0xff] }
  0xf6   : > { %1126 = vmatprep.subr.mxu1 %v553_v17 }
  0xf7   : > { %1127 = vmatpush3.msra.mxu1 %v553_v17  ;;  %v812_v17 = vpop.permute.xlu0 %811 }
  0xf8   : > { %1128 = vmatprep.subr.mxu1 %v552_v18 }
  0xf9   : > { %1129 = vmatpush3.msra.mxu1 %v552_v18 }
  0xfa   : > { %1130 = vmatprep.subr.mxu1 %v551_v19 }
  0xfb   : > { %1131 = vmatpush3.msra.mxu1 %v551_v19 }
  0xfc   : > { %1133 = vmatmul.mubr.msk.f32.vlgmr.msra.gmra.mxu1 %vm631_vm2, %v562_v20 }
  0xfd   : > { %1135 = vmatprep.mubr.msk.f32.mxu1 %vm631_vm2, %v563_v21 }
 0x100   : > { %1136 = vmatmul.mubr.msk.f32.gmra.mxu1 %vm631_vm2, %v564_v22 }
 0x101   : > { %1138 = vmatprep.mubr.msk.f32.mxu1 %vm631_vm2, %v565_v23 }
 0x104   : > { %1139 = vmatmul.mubr.msk.f32.gmra.mxu1 %vm631_vm2, %v566_v24 }
 0x105   : > { %1141 = vmatprep.mubr.msk.f32.mxu1 %vm631_vm2, %v567_v25 }
 0x108   : > { %1142 = vmatmul.mubr.msk.f32.gmra.mxu1 %vm631_vm2, %v568_v26 }
 0x109   : > { %1144 = vmatprep.mubr.msk.f32.mxu1 %vm631_vm2, %v569_v27 }
 0x10c   : > { %1145 = vmatmul.mubr.msk.f32.gmra.mxu1 %vm631_vm2, %v570_v28 }
 0x1bc   : > { %v1134_v30 = vpop.f32.mrf.mxu1 }
 0x1bd   : > { %v734_v3 = vadd.f32 %v1134_v30, %v589_v2 }
 0x1be   : > { %v728_v31 = vpop.f32.mrf.mxu1 }
 0x1bf   : > { %v729_v7 = vadd.f32 %v728_v31, %v584_v6  ;;  %v788_v10 = vmul.f32 0.01, %v734_v3  ;;  %vm778_vm7 = vcmp.gt.f32.partialorder %v734_v3, 0.0 }
 0x1c0   : > { %v1137_v33 = vpop.f32.mrf.mxu1 }
 0x1c1   : > { %v744_v60 = vadd.f32 %v1137_v33, %v599_v55  ;;  %v787_v12 = vmul.f32 0.01, %v729_v7  ;;  %vm777_vm8 = vcmp.gt.f32.partialorder %v729_v7, 0.0  ;;  %v798_v14 = vsel %vm778_vm7, %v734_v3, %v788_v10 }
 0x1c2   : > { %v738_v35 = vpop.f32.mrf.mxu1 }
 0x1c3   : > { %v739_v63 = vadd.f32 %v738_v35, %v594_v59  ;;  %v790_v4 = vmul.f32 0.01, %v744_v60  ;;  %vm780_vm5 = vcmp.gt.f32.partialorder %v744_v60, 0.0  ;;  %v797_v16 = vsel %vm777_vm8, %v729_v7, %v787_v12 }
 0x1c4   : > { %v1140_v36 = vpop.f32.mrf.mxu1 }
 0x1c5   : > { %v754_v51 = vadd.f32 %v1140_v36, %v609_v42  ;;  %v789_v8 = vmul.f32 0.01, %v739_v63  ;;  %vm779_vm6 = vcmp.gt.f32.partialorder %v739_v63, 0.0  ;;  %v800_v11 = vsel %vm780_vm5, %v744_v60, %v790_v4 }
 0x1c6   : > { %v748_v38 = vpop.f32.mrf.mxu1 }
 0x1c7   : > { %v749_v56 = vadd.f32 %v748_v38, %v604_v46  ;;  %v792_v61 = vmul.f32 0.01, %v754_v51  ;;  %vm782_vm3 = vcmp.gt.f32.partialorder %v754_v51, 0.0  ;;  %v799_v13 = vsel %vm779_vm6, %v739_v63, %v789_v8 }
 0x1c8   : > { %v1143_v40 = vpop.f32.mrf.mxu1 }
 0x1c9   : > { %v764_v44 = vadd.f32 %v1143_v40, %v619_v37  ;;  %v791_v0 = vmul.f32 0.01, %v749_v56  ;;  %vm781_vm4 = vcmp.gt.f32.partialorder %v749_v56, 0.0  ;;  %v802_v5 = vsel %vm782_vm3, %v754_v51, %v792_v61 }
 0x1ca   : > { %v758_v41 = vpop.f32.mrf.mxu1 }
 0x1cb   : > { %v759_v48 = vadd.f32 %v758_v41, %v614_v39  ;;  %v794_v52 = vmul.f32 0.01, %v764_v44  ;;  %vm784_vm0 = vcmp.gt.f32.partialorder %v764_v44, 0.0  ;;  %v801_v9 = vsel %vm781_vm4, %v749_v56, %v791_v0 }
 0x1cc   : > { %v1146_v43 = vpop.f32.mrf.mxu1 }
 0x1cd   : > { %v774_v45 = vadd.f32 %v1146_v43, %v629_v32  ;;  %v793_v57 = vmul.f32 0.01, %v759_v48  ;;  %vm783_vm1 = vcmp.gt.f32.partialorder %v759_v48, 0.0  ;;  %v804_v62 = vsel %vm784_vm0, %v764_v44, %v794_v52 }
 0x1ce   : > { %v768_v47 = vpop.f32.mrf.mxu1 }
 0x1cf   : > { %vm786_vm14 = vcmp.gt.f32.partialorder %v774_v45, 0.0  ;;  %v796_v49 = vmul.f32 0.01, %v774_v45  ;;  %v769_v50 = vadd.f32 %v768_v47, %v624_v34  ;;  %v803_v1 = vsel %vm783_vm1, %v759_v48, %v793_v57 }
 0x1d1   : > { %vm785_vm15 = vcmp.gt.f32.partialorder %v769_v50, 0.0  ;;  %v795_v53 = vmul.f32 0.01, %v769_v50  ;;  %v806_v54 = vsel %vm786_vm14, %v774_v45, %v796_v49 }
 0x1d2   : > { %1148 = vmatpush3.msra.mxu0 %v806_v54 }
 0x1d3   : > { %1149 = vmatprep.subr.mxu0 %v1224_v29  ;;  %v805_v58 = vsel %vm785_vm15, %v769_v50, %v795_v53 }
 0x1d4   : > { %1150 = vmatpush3.msra.mxu0 %v805_v58 }
 0x1d5   : > { %1151 = vmatprep.subr.mxu0 %v1224_v29 }
 0x1d6   : > { %1152 = vmatpush3.msra.mxu0 %v804_v62 }
 0x1d7   : > { %1153 = vmatprep.subr.mxu0 %v1224_v29 }
 0x1d8   : > { %1154 = vmatpush3.msra.mxu0 %v803_v1 }
 0x1d9   : > { %1155 = vmatprep.subr.mxu0 %v1224_v29 }
 0x1da   : > { %1156 = vmatpush3.msra.mxu0 %v802_v5 }
 0x1db   : > { %1157 = vmatprep.subr.mxu0 %v1224_v29 }
 0x1dc   : > { %1158 = vmatpush3.msra.mxu0 %v801_v9 }
 0x1dd   : > { %1159 = vmatprep.subr.mxu0 %v1224_v29 }
 0x1de   : > { %1160 = vmatpush3.msra.mxu0 %v800_v11 }
 0x1df   : > { %1161 = vmatprep.subr.mxu0 %v1224_v29 }
 0x1e0   : > { %1162 = vmatpush3.msra.mxu0 %v799_v13 }
 0x1e1   : > { %1163 = vmatprep.subr.mxu0 %v1224_v29 }
 0x1e2   : > { %1164 = vmatpush3.msra.mxu0 %v798_v14 }
 0x1e3   : > { %1165 = vmatprep.subr.mxu0 %v1224_v29 }
 0x1e4   : > { %1166 = vmatpush3.msra.mxu0 %v797_v16 }
 0x1e5   : > { %1168 = vmatmul.mubr.msk.f32.vlgmr.msra.gmra.mxu0 %vm631_vm2, %v807_v15 }
 0x2a5   : > { %v883_v18 = vpop.f32.mrf.mxu0 }
 0x2a6   : > { %v884_v19 = vadd.f32 %v883_v18, %v812_v17 }
 0x2a7   : > { %v1169_v20 = vpop.f32.mrf.mxu0 }
 0x2a8   : > { %887 = vxpose.xlu1.b32.start.end [1/1] (short) %v884_v19, 128 }
 0x324   : > { %v903_v21 = vpop.trf.xlu1 }
 0x325   : > { %920 = vst.msk [vmem:[%s1452_s20] sm:$0xff] %vm919_vm9, %v903_v21 }
 0x328   : > { %v904_v22 = vpop.trf.xlu1 }
 0x329   : > { %921 = vst.msk [vmem:[%s1452_s20 + $0x8] sm:$0xff] %vm919_vm9, %v904_v22 }
 0x32c   : > { %v905_v23 = vpop.trf.xlu1 }
 0x32d   : > { %922 = vst.msk [vmem:[%s1452_s20 + $0x10] sm:$0xff] %vm919_vm9, %v905_v23 }
 0x330   : > { %v906_v24 = vpop.trf.xlu1 }
 0x331   : > { %923 = vst.msk [vmem:[%s1452_s20 + $0x18] sm:$0xff] %vm919_vm9, %v906_v24 }
 0x334   : > { %v907_v25 = vpop.trf.xlu1 }
 0x335   : > { %924 = vst.msk [vmem:[%s1452_s20 + $0x20] sm:$0xff] %vm919_vm9, %v907_v25 }
 0x338   : > { %v908_v26 = vpop.trf.xlu1 }
 0x339   : > { %925 = vst.msk [vmem:[%s1452_s20 + $0x28] sm:$0xff] %vm919_vm9, %v908_v26 }
 0x33c   : > { %v909_v27 = vpop.trf.xlu1 }
 0x33d   : > { %926 = vst.msk [vmem:[%s1452_s20 + $0x30] sm:$0xff] %vm919_vm9, %v909_v27 }
 0x340   : > { %v910_v28 = vpop.trf.xlu1 }
 0x341   : > { %927 = vst.msk [vmem:[%s1452_s20 + $0x38] sm:$0xff] %vm919_vm9, %v910_v28 }
 0x344   : > { %v911_v29 = vpop.trf.xlu1 }
 0x345   : > { %928 = vst.msk [vmem:[%s1452_s20 + $0x40] sm:$0xff] %vm919_vm9, %v911_v29 }
 0x348   : > { %v912_v30 = vpop.trf.xlu1 }
 0x349   : > { %929 = vst.msk [vmem:[%s1452_s20 + $0x48] sm:$0xff] %vm919_vm9, %v912_v30 }
 0x34c   : > { %v913_v31 = vpop.trf.xlu1 }
 0x34d   : > { %930 = vst.msk [vmem:[%s1452_s20 + $0x50] sm:$0xff] %vm919_vm9, %v913_v31 }
 0x350   : > { %v914_v32 = vpop.trf.xlu1 }
 0x351   : > { %931 = vst.msk [vmem:[%s1452_s20 + $0x58] sm:$0xff] %vm919_vm9, %v914_v32 }
 0x354   : > { %v915_v33 = vpop.trf.xlu1 }
 0x355   : > { %932 = vst.msk [vmem:[%s1452_s20 + $0x60] sm:$0xff] %vm919_vm9, %v915_v33 }
 0x358   : > { %v916_v34 = vpop.trf.xlu1 }
 0x359   : > { %933 = vst.msk [vmem:[%s1452_s20 + $0x68] sm:$0xff] %vm919_vm9, %v916_v34 }
 0x35c   : > { %v917_v35 = vpop.trf.xlu1 }
 0x35d   : > { %934 = vst.msk [vmem:[%s1452_s20 + $0x70] sm:$0xff] %vm919_vm9, %v917_v35 }
 0x360   : > { %v918_v36 = vpop.trf.xlu1 }
 0x361   : > { %935 = vst.msk [vmem:[%s1452_s20 + $0x78] sm:$0xff] %vm919_vm9, %v918_v36 }
 0x362 PF: > { %s17_s26 = sadd.s32 1, %s1221_s26   ;;  %s1503_s24 = smov %s1217_s25 }
 0x363   : > { %p14_p5 = scmp.ge.s32.totalorder %s17_s26, 4   ;;  %s1504_s25 = smov %s1506_s27 }
 0x365   :  { %16 = sbr.rel (!%p14_p5) target bundleno = 2 (0x2), region = 78 }

</bundles_post_ra>
